<compile_context>
chip_gen: v7x
topology: tpu7x:2x2x1
jax: 0.10.0
libtpu: 0.0.40
codegen_flags: <defaults>
</compile_context>

<pallas_src>
import jax
import jax.numpy as jnp
import numpy as np
from jax.experimental import pallas as pl
from jax.experimental.pallas import tpu as pltpu

SEQ = 100      # fixed by x.view(1, -1, 100, 64)
D_IN = 768     # fc1 input
D_H1 = 64      # fc1 output
D_H2 = 16      # fc2 output
POOL = 64      # AvgPool2d((64, 1)) -> mean over the first 64 seq positions
TB_MAX = 128   # batch tile: 128*64*768*2B (bf16) ~= 12 MiB, ~24 MiB double-buffered


def _round_up(n, m):
    return ((n + m - 1) // m) * m


def bert_sentiment_kernel(x_ref, w1_ref, b1_ref, w2_ref, b2_ref, w3_ref, b3_ref,
                          out_ref):
    tb = x_ref.shape[0]

    # fc1 + relu as one big 2D MXU matmul: (tb*64, 768) bf16 @ (768, 64) bf16 -> f32
    x2d = x_ref[...].reshape(tb * POOL, D_IN)
    h1 = jnp.dot(x2d, w1_ref[...],
                 preferred_element_type=jnp.float32) + b1_ref[...]
    h1 = jnp.maximum(h1, 0.0)                                   # (tb*64, 64) f32

    # AvgPool2d((64,1)): mean over the 64 kept seq positions.
    # 1/POOL is folded into w2 in the wrapper, so a plain sum suffices here.
    pooled = jnp.sum(h1.reshape(tb, POOL, D_H1), axis=1)        # (tb, 64)

    # fc2 + relu   (w2 already pre-scaled by 1/POOL)
    h2 = jnp.dot(pooled, w2_ref[...],
                 preferred_element_type=jnp.float32) + b2_ref[...]
    h2 = jnp.maximum(h2, 0.0)                                   # (tb, 16)

    # fc3 + sigmoid, produced lane-dense as (1, tb): w3 (1,16) contracted with h2 (tb,16)
    logits = jax.lax.dot_general(
        w3_ref[...], h2,
        dimension_numbers=(((1,), (1,)), ((), ())),
        preferred_element_type=jnp.float32)                     # (1, tb)
    out_ref[...] = jax.nn.sigmoid(logits + b3_ref[...]).reshape(1, 1, tb)


def bert_sentiment_forward(x, params):
    """x: (B, 100, 768) — output of bert_embedding (bf16 preferred). Returns (B, 1) f32."""
    B = x.shape[0]
    w1, b1, w2, b2, w3, b3 = params

    # Stream x / w1 in bf16, accumulate in f32 on the MXU.
    x_bf = x if x.dtype == jnp.bfloat16 else x.astype(jnp.bfloat16)

    # PyTorch nn.Linear stores W as (out, in); fc1/fc2 want (in, out).
    w1t = jnp.transpose(w1).astype(jnp.bfloat16)                 # (768, 64) bf16
    b1r = b1.reshape(1, D_H1).astype(jnp.float32)
    w2t = (jnp.transpose(w2) / float(POOL)).astype(jnp.float32)  # (64, 16), pool folded
    b2r = b2.reshape(1, D_H2).astype(jnp.float32)
    w3r = w3.reshape(1, D_H2).astype(jnp.float32)                # (1, 16), row-major use
    b3r = b3.reshape(1, 1).astype(jnp.float32)

    tb = min(TB_MAX, B)
    # v7x has 2 TensorCores: make sure the "parallel" batch axis has >= 2 grid steps.
    if B >= 16 and pl.cdiv(B, tb) < 2:
        tb = min(B, max(8, _round_up(pl.cdiv(B, 2), 8)))
    num_tiles = pl.cdiv(B, tb)

    const = lambda shape: pl.BlockSpec(shape, lambda i, _s=len(shape): (0,) * _s)

    out = pl.pallas_call(
        bert_sentiment_kernel,
        out_shape=jax.ShapeDtypeStruct((num_tiles, 1, tb), jnp.float32),
        grid_spec=pltpu.PrefetchScalarGridSpec(
            num_scalar_prefetch=0,
            grid=(num_tiles,),
            in_specs=[
                # Only seq rows 0..63 ever reach the output: window them via the
                # BlockSpec (no wrapper slice, no extra HBM materialization).
                pl.BlockSpec((tb, POOL, D_IN), lambda i: (i, 0, 0)),   # x tile
                const((D_IN, D_H1)),        # w1.T   (VMEM-resident, bf16)
                const((1, D_H1)),           # b1
                const((D_H1, D_H2)),        # w2.T / POOL
                const((1, D_H2)),           # b2
                const((1, D_H2)),           # w3 (row)
                const((1, 1)),              # b3
            ],
            out_specs=pl.BlockSpec((1, 1, tb), lambda i: (i, 0, 0)),
        ),
        compiler_params=pltpu.CompilerParams(
            dimension_semantics=("parallel",),
            vmem_limit_bytes=40 * 1024 * 1024),
    )(x_bf, w1t, b1r, w2t, b2r, w3r, b3r)

    # (num_tiles, 1, tb) -> (B, 1); padded rows in a partial last tile are discarded.
    return out.reshape(num_tiles * tb)[:B].reshape(B, 1)


def init_params(key):
    ks = jax.random.split(key, 6)
    scale = 0.02
    w1 = jax.random.normal(ks[0], (D_H1, D_IN), jnp.float32) * scale   # (64, 768)
    b1 = jax.random.normal(ks[1], (D_H1,), jnp.float32) * scale
    w2 = jax.random.normal(ks[2], (D_H2, D_H1), jnp.float32) * scale   # (16, 64)
    b2 = jax.random.normal(ks[3], (D_H2,), jnp.float32) * scale
    w3 = jax.random.normal(ks[4], (1, D_H2), jnp.float32) * scale      # (1, 16)
    b3 = jax.random.normal(ks[5], (1,), jnp.float32) * scale
    return (w1, b1, w2, b2, w3, b3)


def reference_forward_f32(x, params):
    """Plain-JAX f32 reference mirroring the PyTorch forward semantics."""
    w1, b1, w2, b2, w3, b3 = params
    xf = x.astype(jnp.float32)
    B = xf.shape[0]
    h = jnp.maximum(xf @ w1.T + b1, 0.0)                      # (B, 100, 64)
    h = h.reshape(1, B, SEQ, D_H1)                            # view(1, -1, 100, 64)
    h = jnp.mean(h[:, :, :POOL, :], axis=2, keepdims=True)    # AvgPool2d((64,1))
    h = h.reshape(-1, D_H1)                                   # (B, 64)
    h = jnp.maximum(h @ w2.T + b2, 0.0)                       # (B, 16)
    return jax.nn.sigmoid(h @ w3.T + b3)                      # (B, 1)


def reference_forward_matched(x_bf, params):
    """Reference that mirrors the kernel's bf16 streaming dtypes (x, w1 in bf16)."""
    w1, b1, w2, b2, w3, b3 = params
    B = x_bf.shape[0]
    h = jnp.dot(x_bf[:, :POOL, :].reshape(B * POOL, D_IN),
                jnp.transpose(w1).astype(jnp.bfloat16),
                preferred_element_type=jnp.float32) + b1
    h = jnp.maximum(h, 0.0)
    pooled = jnp.mean(h.reshape(B, POOL, D_H1), axis=1)
    h2 = jnp.maximum(pooled @ w2.T + b2, 0.0)
    return jax.nn.sigmoid(h2 @ w3.T + b3)


if __name__ == "__main__":
    key = jax.random.PRNGKey(0)
    k_x, k_p = jax.random.split(key)

    B = 2
    # bert_embedding output, already in the bf16 streaming dtype.
    x = jax.random.normal(k_x, (B, SEQ, D_IN), jnp.float32).astype(jnp.bfloat16)
    params = init_params(k_p)

    out = jax.block_until_ready(bert_sentiment_forward(x, params))
    assert out.shape == (B, 1)

    # Tight check against a reference using the same streaming dtypes.
    ref_m = jax.block_until_ready(reference_forward_matched(x, params))
    np.testing.assert_allclose(np.asarray(out), np.asarray(ref_m),
                               rtol=2e-3, atol=2e-3)

    # Loose semantic check against the pure-f32 PyTorch-equivalent forward
    # (bf16 streaming of x/w1 is an intentional precision trade).
    ref_f = jax.block_until_ready(reference_forward_f32(x, params))
    np.testing.assert_allclose(np.asarray(out), np.asarray(ref_f),
                               rtol=5e-2, atol=2e-2)

    print("KERNEL_OK")
</pallas_src>

<mosaic_0001>
module attributes {stable_mosaic.version = 11 : i64} {
  func.func @bert_sentiment_kernel(%arg0: i32, %arg1: memref<2x64x768xbf16, #tpu.memory_space<vmem>>, %arg2: memref<768x64xbf16, #tpu.memory_space<vmem>>, %arg3: memref<1x64xf32, #tpu.memory_space<vmem>>, %arg4: memref<64x16xf32, #tpu.memory_space<vmem>>, %arg5: memref<1x16xf32, #tpu.memory_space<vmem>>, %arg6: memref<1x16xf32, #tpu.memory_space<vmem>>, %arg7: memref<1x1xf32, #tpu.memory_space<vmem>>, %arg8: memref<1x1x2xf32, #tpu.memory_space<vmem>>) attributes {dimension_semantics = [#tpu.dimension_semantics<parallel>], iteration_bounds = array<i64: 1>, scalar_prefetch = 0 : i64, scratch_operands = 0 : i64, tpu.core_type = #tpu.core_type<tc>, window_params = [{transform_indices = @transform_0, window_bounds = array<i64: 2, 64, 768>}, {pipeline_mode = #tpu.pipeline_mode<synchronous>, transform_indices = @transform_1, window_bounds = array<i64: 768, 64>}, {pipeline_mode = #tpu.pipeline_mode<synchronous>, transform_indices = @transform_2, window_bounds = array<i64: 1, 64>}, {pipeline_mode = #tpu.pipeline_mode<synchronous>, transform_indices = @transform_3, window_bounds = array<i64: 64, 16>}, {pipeline_mode = #tpu.pipeline_mode<synchronous>, transform_indices = @transform_4, window_bounds = array<i64: 1, 16>}, {pipeline_mode = #tpu.pipeline_mode<synchronous>, transform_indices = @transform_5, window_bounds = array<i64: 1, 16>}, {pipeline_mode = #tpu.pipeline_mode<synchronous>, transform_indices = @transform_6, window_bounds = array<i64: 1, 1>}, {transform_indices = @transform_7, window_bounds = array<i64: 1, 1, 2>}]} {
    %c0 = arith.constant 0 : index
    %c0_0 = arith.constant 0 : index
    %c0_1 = arith.constant 0 : index
    %0 = vector.load %arg1[%c0, %c0_0, %c0_1] : memref<2x64x768xbf16, #tpu.memory_space<vmem>>, vector<2x64x768xbf16>
    %1 = vector.shape_cast %0 : vector<2x64x768xbf16> to vector<128x768xbf16>
    %c0_2 = arith.constant 0 : index
    %c0_3 = arith.constant 0 : index
    %2 = vector.load %arg2[%c0_2, %c0_3] : memref<768x64xbf16, #tpu.memory_space<vmem>>, vector<768x64xbf16>
    %cst = arith.constant dense<0.000000e+00> : vector<128x64xf32>
    %3 = tpu.matmul %1, %2, %cst {dimension_numbers = #tpu.dot_dimension_numbers<[1], [0], [0], [1], [0, 0, 1, 1], [], []>} : vector<128x768xbf16>, vector<768x64xbf16>, vector<128x64xf32> -> vector<128x64xf32>
    %c0_4 = arith.constant 0 : index
    %c0_5 = arith.constant 0 : index
    %4 = vector.load %arg3[%c0_4, %c0_5] : memref<1x64xf32, #tpu.memory_space<vmem>>, vector<1x64xf32>
    %5 = vector.broadcast %4 : vector<1x64xf32> to vector<128x64xf32>
    %6 = arith.addf %3, %5 : vector<128x64xf32>
    %cst_6 = arith.constant 0.000000e+00 : f32
    %7 = vector.broadcast %cst_6 : f32 to vector<128x64xf32>
    %8 = arith.maximumf %6, %7 : vector<128x64xf32>
    %9 = vector.shape_cast %8 : vector<128x64xf32> to vector<2x64x64xf32>
    %cst_7 = arith.constant dense<0.000000e+00> : vector<2x64xf32>
    %10 = vector.multi_reduction <add>, %9, %cst_7 [1] : vector<2x64x64xf32> to vector<2x64xf32>
    %c0_8 = arith.constant 0 : index
    %c0_9 = arith.constant 0 : index
    %11 = vector.load %arg4[%c0_8, %c0_9] : memref<64x16xf32, #tpu.memory_space<vmem>>, vector<64x16xf32>
    %cst_10 = arith.constant dense<0.000000e+00> : vector<2x16xf32>
    %12 = tpu.matmul %10, %11, %cst_10 {dimension_numbers = #tpu.dot_dimension_numbers<[1], [0], [0], [1], [0, 0, 1, 1], [], []>} : vector<2x64xf32>, vector<64x16xf32>, vector<2x16xf32> -> vector<2x16xf32>
    %c0_11 = arith.constant 0 : index
    %c0_12 = arith.constant 0 : index
    %13 = vector.load %arg5[%c0_11, %c0_12] : memref<1x16xf32, #tpu.memory_space<vmem>>, vector<1x16xf32>
    %14 = vector.broadcast %13 : vector<1x16xf32> to vector<2x16xf32>
    %15 = arith.addf %12, %14 : vector<2x16xf32>
    %cst_13 = arith.constant 0.000000e+00 : f32
    %16 = vector.broadcast %cst_13 : f32 to vector<2x16xf32>
    %17 = arith.maximumf %15, %16 : vector<2x16xf32>
    %c0_14 = arith.constant 0 : index
    %c0_15 = arith.constant 0 : index
    %18 = vector.load %arg6[%c0_14, %c0_15] : memref<1x16xf32, #tpu.memory_space<vmem>>, vector<1x16xf32>
    %cst_16 = arith.constant dense<0.000000e+00> : vector<1x2xf32>
    %19 = tpu.matmul %18, %17, %cst_16 {dimension_numbers = #tpu.dot_dimension_numbers<[1], [1], [0], [0], [0, 0, 1, 0], [], []>} : vector<1x16xf32>, vector<2x16xf32>, vector<1x2xf32> -> vector<1x2xf32>
    %c0_17 = arith.constant 0 : index
    %c0_18 = arith.constant 0 : index
    %20 = vector.load %arg7[%c0_17, %c0_18] : memref<1x1xf32, #tpu.memory_space<vmem>>, vector<1x1xf32>
    %21 = vector.broadcast %20 : vector<1x1xf32> to vector<1x2xf32>
    %22 = arith.addf %19, %21 : vector<1x2xf32>
    %23 = arith.negf %22 : vector<1x2xf32>
    %24 = math.exp %23 : vector<1x2xf32>
    %cst_19 = arith.constant 1.000000e+00 : f32
    %25 = vector.broadcast %cst_19 : f32 to vector<1x2xf32>
    %26 = arith.addf %25, %24 : vector<1x2xf32>
    %27 = arith.divf %25, %26 : vector<1x2xf32>
    %28 = vector.shape_cast %27 : vector<1x2xf32> to vector<1x1x2xf32>
    %c0_20 = arith.constant 0 : index
    %c0_21 = arith.constant 0 : index
    %c0_22 = arith.constant 0 : index
    %29 = vector.load %arg8[%c0_20, %c0_21, %c0_22] : memref<1x1x2xf32, #tpu.memory_space<vmem>>, vector<1x1x2xf32>
    tpu.vector_store %arg8[%c0_20, %c0_21, %c0_22], %28 {strides = array<i32>} : memref<1x1x2xf32, #tpu.memory_space<vmem>>, vector<1x1x2xf32>,
    return
  }
  func.func @transform_0(%arg0: i32) -> (i32, i32, i32) {
    %c0_i32 = arith.constant 0 : i32
    %c0_i32_0 = arith.constant 0 : i32
    %c0_i32_1 = arith.constant 0 : i32
    return %arg0, %c0_i32, %c0_i32_0 : i32, i32, i32
  }
  func.func @transform_1(%arg0: i32) -> (i32, i32) {
    %c0_i32 = arith.constant 0 : i32
    %c0_i32_0 = arith.constant 0 : i32
    %c0_i32_1 = arith.constant 0 : i32
    return %c0_i32, %c0_i32_0 : i32, i32
  }
  func.func @transform_2(%arg0: i32) -> (i32, i32) {
    %c0_i32 = arith.constant 0 : i32
    %c0_i32_0 = arith.constant 0 : i32
    %c0_i32_1 = arith.constant 0 : i32
    return %c0_i32, %c0_i32_0 : i32, i32
  }
  func.func @transform_3(%arg0: i32) -> (i32, i32) {
    %c0_i32 = arith.constant 0 : i32
    %c0_i32_0 = arith.constant 0 : i32
    %c0_i32_1 = arith.constant 0 : i32
    return %c0_i32, %c0_i32_0 : i32, i32
  }
  func.func @transform_4(%arg0: i32) -> (i32, i32) {
    %c0_i32 = arith.constant 0 : i32
    %c0_i32_0 = arith.constant 0 : i32
    %c0_i32_1 = arith.constant 0 : i32
    return %c0_i32, %c0_i32_0 : i32, i32
  }
  func.func @transform_5(%arg0: i32) -> (i32, i32) {
    %c0_i32 = arith.constant 0 : i32
    %c0_i32_0 = arith.constant 0 : i32
    %c0_i32_1 = arith.constant 0 : i32
    return %c0_i32, %c0_i32_0 : i32, i32
  }
  func.func @transform_6(%arg0: i32) -> (i32, i32) {
    %c0_i32 = arith.constant 0 : i32
    %c0_i32_0 = arith.constant 0 : i32
    %c0_i32_1 = arith.constant 0 : i32
    return %c0_i32, %c0_i32_0 : i32, i32
  }
  func.func @transform_7(%arg0: i32) -> (i32, i32, i32) {
    %c0_i32 = arith.constant 0 : i32
    %c0_i32_0 = arith.constant 0 : i32
    %c0_i32_1 = arith.constant 0 : i32
    return %arg0, %c0_i32, %c0_i32_0 : i32, i32, i32
  }
}

</mosaic_0001>

<bundles_post_ra>
// kernel: tpu_custom_call.1
= control target key start
LH: loop header
LB: loop body
LE: loop exit
PB: predicated region body
PF: predicated region fallthrough
CT: control target
= control target key end

     0   :  { %s2345_s0 = inlined_call_operand.vmem [shape: bf16[2,100,768], index: 0, kind: input, shape index: {}]   ;;  %s2346_s1 = inlined_call_operand.vmem [shape: bf16[768,64], index: 1, kind: input, shape index: {}]   ;;  %s2347_s2 = inlined_call_operand.vmem [shape: f32[1,64], index: 2, kind: input, shape index: {}]   ;;  %s2348_s3 = inlined_call_operand.vmem [shape: f32[64,16], index: 3, kind: input, shape index: {}]   ;;  %s2349_s4 = inlined_call_operand.vmem [shape: f32[1,16], index: 4, kind: input, shape index: {}]   ;;  %s2350_s5 = inlined_call_operand.vmem [shape: f32[1,16], index: 5, kind: input, shape index: {}]   ;;  %s2351_s6 = inlined_call_operand.<no memory space> [shape: f32[1,1], index: 6, kind: input, shape index: {}]   ;;  %s2352_s7 = inlined_call_operand.hbm [shape: f32[1,1,2], index: 7, kind: output, shape index: {}]  }
   0x1   :  { %v12_v0 = vstv %s2351_s6 }
   0x2   :  { %13 = vst [vmem:[#allocation2] sm:$0x1] %v12_v0 }
   0x3   :  { %v1741_v1 = vld [vmem:[%s2346_s1 + $0x40] sm:$0xff]   ;;  %v1743_v3 = vld [vmem:[%s2346_s1 + $0x48] sm:$0xff]   ;;  %v1745_v5 = vld [vmem:[%s2346_s1 + $0x50] sm:$0xff]  }
   0x4   :  { %v1742_v2 = vld [vmem:[%s2346_s1] sm:$0xff]   ;;  %1480 = vmatprep.subr.bf16.mxu0 %v1741_v1  ;;  %1719 = vmatprep.subr.bf16.mxu1 %v1741_v1  ;;  %v1744_v4 = vld [vmem:[%s2346_s1 + $0x8] sm:$0xff]   ;;  %v1746_v6 = vld [vmem:[%s2346_s1 + $0x10] sm:$0xff]  }
   0x5   :  { %1481 = vmatpush3.bf16.msra.mxu0 %v1742_v2  ;;  %1727 = vmatpush3.bf16.msra.mxu1 %v1742_v2  ;;  %v1747_v7 = vld [vmem:[%s2346_s1 + $0x58] sm:$0xff]   ;;  %v1749_v9 = vld [vmem:[%s2346_s1 + $0x60] sm:$0xff]   ;;  %v1751_v11 = vld [vmem:[%s2346_s1 + $0x68] sm:$0xff]  }
   0x6   :  { %1482 = vmatprep.subr.bf16.mxu0 %v1743_v3  ;;  %1720 = vmatprep.subr.bf16.mxu1 %v1743_v3  ;;  %v1748_v8 = vld [vmem:[%s2346_s1 + $0x18] sm:$0xff]   ;;  %v1750_v10 = vld [vmem:[%s2346_s1 + $0x20] sm:$0xff]   ;;  %v1752_v14 = vld [vmem:[%s2346_s1 + $0x28] sm:$0xff]  }
   0x7   :  { %v1759_v12 = vld [vmem:[%s2345_s0 + $0x4] ss:$24 sps:$4 sm:$0xff]   ;;  %v1753_v15 = vld [vmem:[%s2346_s1 + $0x70] sm:$0xff]   ;;  %v1757_v19 = vld [vmem:[%s2345_s0] ss:$24 sps:$4 sm:$0xff]  }
   0x8   :  { %v1762_v13 = vld [vmem:[%s2345_s0 + $0x13c] ss:$24 sps:$4 sm:$0xff]   ;;  %854 = vmatprep.mubr.bf16.mxu0 %v1759_v12  ;;  %v1760_v20 = vld [vmem:[%s2345_s0 + $0x138] ss:$24 sps:$4 sm:$0xff]   ;;  %v1763_v21 = vld [vmem:[%s2346_s1 + $0xc0] sm:$0xff]  }
   0x9   :  { %1483 = vmatpush3.bf16.msra.mxu0 %v1744_v4  ;;  %1728 = vmatpush3.bf16.msra.mxu1 %v1744_v4  ;;  %v1754_v16 = vld [vmem:[%s2346_s1 + $0x30] sm:$0xff]   ;;  %v1755_v17 = vld [vmem:[%s2346_s1 + $0x78] sm:$0xff]   ;;  %v1764_v22 = vld [vmem:[%s2346_s1 + $0x140] sm:$0xff]  }
   0xa   :  { %1484 = vmatprep.subr.bf16.mxu0 %v1745_v5  ;;  %1721 = vmatprep.subr.bf16.mxu1 %v1745_v5  ;;  %v1756_v18 = vld [vmem:[%s2346_s1 + $0x38] sm:$0xff]   ;;  %v1765_v23 = vld [vmem:[%s2346_s1 + $0x80] sm:$0xff]   ;;  %v1767_v25 = vld [vmem:[%s2346_s1 + $0xc8] sm:$0xff]  }
   0xb   :  { %886 = vmatprep.mubr.bf16.mxu1 %v1762_v13  ;;  %v1766_v24 = vld [vmem:[%s2346_s1 + $0x100] sm:$0xff]   ;;  %v1768_v26 = vld [vmem:[%s2346_s1 + $0x148] sm:$0xff]   ;;  %v1777_v31 = vld [vmem:[%s2346_s1 + $0xd0] sm:$0xff]  }
   0xc   :  { %v1771_v27 = vld [vmem:[%s2345_s0 + $0x34] ss:$24 sps:$4 sm:$0xff]   ;;  %v1775_v32 = vld [vmem:[%s2345_s0 + $0x30] ss:$24 sps:$4 sm:$0xff]   ;;  %v1781_v37 = vld [vmem:[%s2346_s1 + $0xd8] sm:$0xff]  }
   0xd   :  { %1485 = vmatpush3.bf16.msra.mxu0 %v1746_v6  ;;  %1729 = vmatpush3.bf16.msra.mxu1 %v1746_v6  ;;  %v1769_v28 = vld [vmem:[%s2346_s1 + $0x88] sm:$0xff]   ;;  %v1778_v33 = vld [vmem:[%s2346_s1 + $0x150] sm:$0xff]   ;;  %v1782_v38 = vld [vmem:[%s2346_s1 + $0x158] sm:$0xff]  }
   0xe   :  { %1486 = vmatprep.subr.bf16.mxu0 %v1747_v7  ;;  %1722 = vmatprep.subr.bf16.mxu1 %v1747_v7  ;;  %v1773_v29 = vld [vmem:[%s2345_s0 + $0x16c] ss:$24 sps:$4 sm:$0xff]   ;;  %v1776_v34 = vld [vmem:[%s2345_s0 + $0x168] ss:$24 sps:$4 sm:$0xff]   ;;  %v1779_v35 = vld [vmem:[%s2346_s1 + $0x90] sm:$0xff]  }
   0xf   :  { %v1770_v30 = vld [vmem:[%s2346_s1 + $0x108] sm:$0xff]   ;;  %v1780_v36 = vld [vmem:[%s2346_s1 + $0x110] sm:$0xff]   ;;  %v1785_v39 = vld [vmem:[%s2345_s0 + $0x64] ss:$24 sps:$4 sm:$0xff]  }
  0x10   :  { %v1783_v40 = vld [vmem:[%s2346_s1 + $0x98] sm:$0xff]   ;;  %v1791_v43 = vld [vmem:[%s2346_s1 + $0xe0] sm:$0xff]   ;;  %v1795_v49 = vld [vmem:[%s2346_s1 + $0xe8] sm:$0xff]  }
  0x11   :  { %1487 = vmatpush3.bf16.msra.mxu0 %v1748_v8  ;;  %1730 = vmatpush3.bf16.msra.mxu1 %v1748_v8  ;;  %v1787_v41 = vld [vmem:[%s2345_s0 + $0x19c] ss:$24 sps:$4 sm:$0xff]   ;;  %v1789_v44 = vld [vmem:[%s2345_s0 + $0x60] ss:$24 sps:$4 sm:$0xff]   ;;  %v1796_v50 = vld [vmem:[%s2346_s1 + $0x168] sm:$0xff]  }
  0x12   :  { %1488 = vmatprep.subr.bf16.mxu0 %v1749_v9  ;;  %1723 = vmatprep.subr.bf16.mxu1 %v1749_v9  ;;  %v1784_v42 = vld [vmem:[%s2346_s1 + $0x118] sm:$0xff]   ;;  %v1792_v46 = vld [vmem:[%s2346_s1 + $0x160] sm:$0xff]   ;;  %v1799_v51 = vld [vmem:[%s2345_s0 + $0x94] ss:$24 sps:$4 sm:$0xff]  }
  0x13   :  { %v1790_v45 = vld [vmem:[%s2345_s0 + $0x198] ss:$24 sps:$4 sm:$0xff]   ;;  %v1793_v47 = vld [vmem:[%s2346_s1 + $0xa0] sm:$0xff]   ;;  %v1797_v53 = vld [vmem:[%s2346_s1 + $0xa8] sm:$0xff]  }
  0x14   :  { %v1794_v48 = vld [vmem:[%s2346_s1 + $0x120] sm:$0xff]   ;;  %v1798_v54 = vld [vmem:[%s2346_s1 + $0x128] sm:$0xff]   ;;  %v1805_v55 = vld [vmem:[%s2346_s1 + $0xf0] sm:$0xff]  }
  0x15   :  { %1489 = vmatpush3.bf16.msra.mxu0 %v1750_v10  ;;  %1731 = vmatpush3.bf16.msra.mxu1 %v1750_v10  ;;  %v1801_v52 = vld [vmem:[%s2345_s0 + $0x1cc] ss:$24 sps:$4 sm:$0xff]   ;;  %v1803_v56 = vld [vmem:[%s2345_s0 + $0x90] ss:$24 sps:$4 sm:$0xff]   ;;  %v1809_v61 = vld [vmem:[%s2346_s1 + $0xf8] sm:$0xff]  }
  0x16   :  { %1490 = vmatprep.subr.bf16.mxu0 %v1751_v11  ;;  %1724 = vmatprep.subr.bf16.mxu1 %v1751_v11  ;;  %v1804_v57 = vld [vmem:[%s2345_s0 + $0x1c8] ss:$24 sps:$4 sm:$0xff]   ;;  %v1806_v58 = vld [vmem:[%s2346_s1 + $0x170] sm:$0xff]   ;;  %v1810_v62 = vld [vmem:[%s2346_s1 + $0x178] sm:$0xff]  }
  0x17   :  { %v1807_v59 = vld [vmem:[%s2346_s1 + $0xb0] sm:$0xff]   ;;  %v1811_v63 = vld [vmem:[%s2346_s1 + $0xb8] sm:$0xff]   ;;  %v1815_v1 = vld [vmem:[%s2345_s0 + $0xc] ss:$24 sps:$4 sm:$0xff]  }
  0x18   :  { %v1808_v60 = vld [vmem:[%s2346_s1 + $0x130] sm:$0xff]   ;;  %v1812_v0 = vld [vmem:[%s2346_s1 + $0x138] sm:$0xff]   ;;  %v1813_v2 = vld [vmem:[%s2345_s0 + $0x8] ss:$24 sps:$4 sm:$0xff]  }
  0x19   :  { %1491 = vmatpush3.bf16.msra.mxu0 %v1752_v14  ;;  %1732 = vmatpush3.bf16.msra.mxu1 %v1752_v14  ;;  %v1818_v3 = vld [vmem:[%s2345_s0 + $0x14] ss:$24 sps:$4 sm:$0xff]   ;;  %v1816_v4 = vld [vmem:[%s2345_s0 + $0x10] ss:$24 sps:$4 sm:$0xff]   ;;  %v1821_v6 = vld [vmem:[%s2345_s0 + $0x44] ss:$24 sps:$4 sm:$0xff]  }
  0x1a   :  { %1492 = vmatprep.subr.bf16.mxu0 %v1753_v15  ;;  %1725 = vmatprep.subr.bf16.mxu1 %v1753_v15  ;;  %v1819_v5 = vld [vmem:[%s2345_s0 + $0x3c] ss:$24 sps:$4 sm:$0xff]   ;;  %v1823_v7 = vld [vmem:[%s2345_s0 + $0x38] ss:$24 sps:$4 sm:$0xff]   ;;  %v1825_v9 = vld [vmem:[%s2345_s0 + $0x6c] ss:$24 sps:$4 sm:$0xff]  }
  0x1b   :  { %v1824_v8 = vld [vmem:[%s2345_s0 + $0x40] ss:$24 sps:$4 sm:$0xff]   ;;  %v1827_v10 = vld [vmem:[%s2345_s0 + $0x74] ss:$24 sps:$4 sm:$0xff]   ;;  %v1830_v12 = vld [vmem:[%s2345_s0 + $0x70] ss:$24 sps:$4 sm:$0xff]  }
  0x1c   :  { %v1829_v11 = vld [vmem:[%s2345_s0 + $0x68] ss:$24 sps:$4 sm:$0xff]   ;;  %v1831_v13 = vld [vmem:[%s2345_s0 + $0x9c] ss:$24 sps:$4 sm:$0xff]  }
  0x1d   :  { %1493 = vmatpush3.bf16.msra.mxu0 %v1754_v16  ;;  %1733 = vmatpush3.bf16.msra.mxu1 %v1754_v16  ;;  %v1833_v14 = vld [vmem:[%s2345_s0 + $0xa4] ss:$24 sps:$4 sm:$0xff]  }
  0x1e   :  { %1494 = vmatprep.subr.bf16.mxu0 %v1755_v17  ;;  %1726 = vmatprep.subr.bf16.mxu1 %v1755_v17 }
  0x21   :  { %1495 = vmatpush3.bf16.msra.mxu0 %v1756_v18  ;;  %1734 = vmatpush3.bf16.msra.mxu1 %v1756_v18 }
  0x22   :  { %1544 = vmatprep.subr.bf16.mxu1 %v1763_v21  ;;  %1608 = vmatprep.subr.bf16.mxu0 %v1764_v22 }
  0x24   :  { %855 = vmatmul.mubr.bf16.vlgmr.msra.gmra.mrb[0].mxu0 %v1757_v19  ;;  %887 = vmatmul.mubr.bf16.vlgmr.msra.gmra.mrb[0].mxu1 %v1760_v20 }
  0x25   :  { %1545 = vmatpush3.bf16.msra.mxu1 %v1765_v23  ;;  %1609 = vmatpush3.bf16.msra.mxu0 %v1766_v24 }
  0x26   :  { %1546 = vmatprep.subr.bf16.mxu1 %v1767_v25  ;;  %1610 = vmatprep.subr.bf16.mxu0 %v1768_v26 }
  0x27   :  { %862 = vmatprep.mubr.bf16.mxu0 %v1771_v27  ;;  %894 = vmatprep.mubr.bf16.mxu1 %v1773_v29 }
  0x29   :  { %1547 = vmatpush3.bf16.msra.mxu1 %v1769_v28  ;;  %1611 = vmatpush3.bf16.msra.mxu0 %v1770_v30 }
  0x2a   :  { %1548 = vmatprep.subr.bf16.mxu1 %v1777_v31  ;;  %1612 = vmatprep.subr.bf16.mxu0 %v1778_v33 }
  0x2c   :  { %863 = vmatmul.mubr.bf16.gmra.mrb[4].mxu0 %v1775_v32  ;;  %895 = vmatmul.mubr.bf16.gmra.mrb[4].mxu1 %v1776_v34 }
  0x2d   :  { %1549 = vmatpush3.bf16.msra.mxu1 %v1779_v35  ;;  %1613 = vmatpush3.bf16.msra.mxu0 %v1780_v36 }
  0x2e   :  { %1550 = vmatprep.subr.bf16.mxu1 %v1781_v37  ;;  %1614 = vmatprep.subr.bf16.mxu0 %v1782_v38 }
  0x2f   :  { %870 = vmatprep.mubr.bf16.mxu0 %v1785_v39  ;;  %902 = vmatprep.mubr.bf16.mxu1 %v1787_v41 }
  0x31   :  { %1551 = vmatpush3.bf16.msra.mxu1 %v1783_v40  ;;  %1615 = vmatpush3.bf16.msra.mxu0 %v1784_v42 }
  0x32   :  { %1552 = vmatprep.subr.bf16.mxu1 %v1791_v43  ;;  %1616 = vmatprep.subr.bf16.mxu0 %v1792_v46 }
  0x34   :  { %871 = vmatmul.mubr.bf16.gmra.mrb[8].mxu0 %v1789_v44  ;;  %903 = vmatmul.mubr.bf16.gmra.mrb[8].mxu1 %v1790_v45 }
  0x35   :  { %1553 = vmatpush3.bf16.msra.mxu1 %v1793_v47  ;;  %1617 = vmatpush3.bf16.msra.mxu0 %v1794_v48 }
  0x36   :  { %1554 = vmatprep.subr.bf16.mxu1 %v1795_v49  ;;  %1618 = vmatprep.subr.bf16.mxu0 %v1796_v50 }
  0x37   :  { %878 = vmatprep.mubr.bf16.mxu0 %v1799_v51  ;;  %910 = vmatprep.mubr.bf16.mxu1 %v1801_v52 }
  0x39   :  { %1555 = vmatpush3.bf16.msra.mxu1 %v1797_v53  ;;  %1619 = vmatpush3.bf16.msra.mxu0 %v1798_v54 }
  0x3a   :  { %1556 = vmatprep.subr.bf16.mxu1 %v1805_v55  ;;  %1620 = vmatprep.subr.bf16.mxu0 %v1806_v58 }
  0x3c   :  { %879 = vmatmul.mubr.bf16.gmra.mrb[12].mxu0 %v1803_v56  ;;  %911 = vmatmul.mubr.bf16.gmra.mrb[12].mxu1 %v1804_v57 }
  0x3d   :  { %1557 = vmatpush3.bf16.msra.mxu1 %v1807_v59  ;;  %1621 = vmatpush3.bf16.msra.mxu0 %v1808_v60 }
  0x3e   :  { %1558 = vmatprep.subr.bf16.mxu1 %v1809_v61  ;;  %1622 = vmatprep.subr.bf16.mxu0 %v1810_v62 }
  0x3f   :  { %951 = vmatprep.mubr.bf16.mxu1 %v1815_v1  ;;  %1048 = vmatprep.mubr.bf16.mxu0 %v1818_v3 }
  0x41   :  { %1559 = vmatpush3.bf16.msra.mxu1 %v1811_v63  ;;  %1623 = vmatpush3.bf16.msra.mxu0 %v1812_v0 }
  0x44   :  { %952 = vmatmul.mubr.bf16.vlgmr.msra.gmra.mrb[16].mxu1 %v1813_v2  ;;  %1049 = vmatmul.mubr.bf16.vlgmr.msra.gmra.mrb[16].mxu0 %v1816_v4 }
  0x45   :  { %959 = vmatprep.mubr.bf16.mxu1 %v1819_v5  ;;  %1056 = vmatprep.mubr.bf16.mxu0 %v1821_v6 }
  0x4c   :  { %960 = vmatmul.mubr.bf16.gmra.mrb[20].mxu1 %v1823_v7  ;;  %1057 = vmatmul.mubr.bf16.gmra.mrb[20].mxu0 %v1824_v8 }
  0x4d   :  { %967 = vmatprep.mubr.bf16.mxu1 %v1825_v9  ;;  %1064 = vmatprep.mubr.bf16.mxu0 %v1827_v10 }
  0x4e   :  { %14 = vsyncpa [#allocation5], 0  ;;  %v1835_v15 = vld [vmem:[%s2345_s0 + $0x98] ss:$24 sps:$4 sm:$0xff]   ;;  %v1837_v17 = vld [vmem:[%s2345_s0 + $0x144] ss:$24 sps:$4 sm:$0xff]  }
  0x4f   :  { %v1836_v16 = vld [vmem:[%s2345_s0 + $0xa0] ss:$24 sps:$4 sm:$0xff]   ;;  %v1839_v18 = vld [vmem:[%s2345_s0 + $0x14c] ss:$24 sps:$4 sm:$0xff]   ;;  %v1845_v22 = vld [vmem:[%s2345_s0 + $0x17c] ss:$24 sps:$4 sm:$0xff]  }
  0x50   :  { %v1841_v19 = vld [vmem:[%s2345_s0 + $0x140] ss:$24 sps:$4 sm:$0xff]   ;;  %v1843_v21 = vld [vmem:[%s2345_s0 + $0x174] ss:$24 sps:$4 sm:$0xff]   ;;  %v1847_v23 = vld [vmem:[%s2345_s0 + $0x170] ss:$24 sps:$4 sm:$0xff]  }
  0x51   :  { %v1842_v20 = vld [vmem:[%s2345_s0 + $0x148] ss:$24 sps:$4 sm:$0xff]   ;;  %v1848_v24 = vld [vmem:[%s2345_s0 + $0x178] ss:$24 sps:$4 sm:$0xff]   ;;  %v1849_v25 = vld [vmem:[%s2345_s0 + $0x1a4] ss:$24 sps:$4 sm:$0xff]  }
  0x52   :  { %v1851_v26 = vld [vmem:[%s2345_s0 + $0x1ac] ss:$24 sps:$4 sm:$0xff]   ;;  %v1853_v27 = vld [vmem:[%s2345_s0 + $0x1a0] ss:$24 sps:$4 sm:$0xff]   ;;  %v1857_v30 = vld [vmem:[%s2345_s0 + $0x1dc] ss:$24 sps:$4 sm:$0xff]  }
  0x53   :  { %v1854_v28 = vld [vmem:[%s2345_s0 + $0x1a8] ss:$24 sps:$4 sm:$0xff]   ;;  %v1855_v29 = vld [vmem:[%s2345_s0 + $0x1d4] ss:$24 sps:$4 sm:$0xff]   ;;  %v1860_v32 = vld [vmem:[%s2345_s0 + $0x1d8] ss:$24 sps:$4 sm:$0xff]  }
  0x54   :  { %968 = vmatmul.mubr.bf16.gmra.mrb[24].mxu1 %v1829_v11  ;;  %1065 = vmatmul.mubr.bf16.gmra.mrb[24].mxu0 %v1830_v12  ;;  %v1859_v31 = vld [vmem:[%s2345_s0 + $0x1d0] ss:$24 sps:$4 sm:$0xff]   ;;  %v1172_v33 = vld [vmem:[%s2348_s3] sm:$0xff]  ;;  %v1889_v36 = vmov 0.0|0.0   ;;  %v1175_v38 = vld [vmem:[%s2348_s3 + $0x18] sm:$0xff]  ;;  %vm1890_vm0 = vmmov 0  }
  0x55   :  { %975 = vmatprep.mubr.bf16.mxu1 %v1831_v13  ;;  %1072 = vmatprep.mubr.bf16.mxu0 %v1833_v14  ;;  %v1173_v34 = vld [vmem:[%s2348_s3 + $0x8] sm:$0xff]  ;;  %v1174_v37 = vld [vmem:[%s2348_s3 + $0x10] sm:$0xff]  ;;  %v1176_v40 = vld [vmem:[%s2348_s3 + $0x20] sm:$0xff]  ;;  %v1891_v46 = vmov 0.0   ;;  %vm1129_vm1 = vcmask 523264   ;;  %vm1189_vm2 = vcmask 1041409  }
  0x56   :  { %v1708_v35 = vpack.c.bf16 %v1173_v34, %v1172_v33  ;;  %1707 = vmatprep.subr.bf16.mxu0 %v1889_v36  ;;  %v1711_v39 = vpack.c.bf16 %v1175_v38, %v1174_v37  ;;  %v1177_v41 = vld [vmem:[%s2348_s3 + $0x28] sm:$0xff]  ;;  %v1178_v43 = vld [vmem:[%s2348_s3 + $0x30] sm:$0xff]  ;;  %v1179_v44 = vld [vmem:[%s2348_s3 + $0x38] sm:$0xff]  ;;  %1702 = vmatprep.subr.mxu1 %v1891_v46  ;;  %vm1275_vm3 = vcmask 130048   ;;  %vm1358_vm4 = vcmask 8192  }
  0x57   :  { %v1714_v42 = vpack.c.bf16 %v1177_v41, %v1176_v40  ;;  %v1717_v45 = vpack.c.bf16 %v1179_v44, %v1178_v43 }
  0x58   :  { %1709 = vmatpush3.bf16.msra.mxu0 %v1708_v35 }
  0x59   :  { %1710 = vmatprep.subr.bf16.mxu0 %v1889_v36 }
  0x5c   :  { %976 = vmatmul.mubr.bf16.gmra.mrb[28].mxu1 %v1835_v15  ;;  %1073 = vmatmul.mubr.bf16.gmra.mrb[28].mxu0 %v1836_v16 }
  0x5d   :  { %983 = vmatprep.mubr.bf16.mxu1 %v1837_v17  ;;  %1080 = vmatprep.mubr.bf16.mxu0 %v1839_v18 }
  0x5e   :  { %1712 = vmatpush3.bf16.msra.mxu0 %v1711_v39 }
  0x5f   :  { %1713 = vmatprep.subr.bf16.mxu0 %v1889_v36 }
  0x62   :  { %1715 = vmatpush3.bf16.msra.mxu0 %v1714_v42 }
  0x63   :  { %1716 = vmatprep.subr.bf16.mxu0 %v1889_v36 }
  0x64   :  { %984 = vmatmul.mubr.bf16.gmra.mrb[32].mxu1 %v1841_v19  ;;  %1081 = vmatmul.mubr.bf16.gmra.mrb[32].mxu0 %v1842_v20 }
  0x65   :  { %991 = vmatprep.mubr.bf16.mxu1 %v1843_v21  ;;  %1088 = vmatprep.mubr.bf16.mxu0 %v1845_v22 }
  0x66   :  { %1718 = vmatpush3.bf16.msra.mxu0 %v1717_v45 }
  0x6c   :  { %992 = vmatmul.mubr.bf16.gmra.mrb[36].mxu1 %v1847_v23  ;;  %1089 = vmatmul.mubr.bf16.gmra.mrb[36].mxu0 %v1848_v24 }
  0x6d   :  { %999 = vmatprep.mubr.bf16.mxu1 %v1849_v25  ;;  %1096 = vmatprep.mubr.bf16.mxu0 %v1851_v26 }
  0x74   :  { %1000 = vmatmul.mubr.bf16.gmra.mrb[40].mxu1 %v1853_v27  ;;  %1097 = vmatmul.mubr.bf16.gmra.mrb[40].mxu0 %v1854_v28 }
  0x75   :  { %1007 = vmatprep.mubr.bf16.mxu1 %v1855_v29  ;;  %1104 = vmatprep.mubr.bf16.mxu0 %v1857_v30 }
  0x7c   :  { %1008 = vmatmul.mubr.bf16.gmra.mrb[44].mxu1 %v1859_v31  ;;  %1105 = vmatmul.mubr.bf16.gmra.mrb[44].mxu0 %v1860_v32  ;;  %v2276_v31 = vld [vmem:[%s2347_s2] ss:$0 sm:$0xff] }
  0x7d   :  { %1699 = vmatprep.mubr.msk.f32.mxu0 %vm1890_vm0, %v1891_v46  ;;  %1704 = vmatprep.mubr.msk.f32.mxu1 %vm1890_vm0, %v1891_v46 }
  0xf7   :  { %v1496_v47 = vpop.f32.mrb[0].mxu0  ;;  %v1520_v48 = vpop.f32.mrb[0].mxu1 }
  0xf8   :  { %v1497_v49 = vpop.f32.mrb[1].mxu0  ;;  %v1521_v50 = vpop.f32.mrb[1].mxu1 }
  0xf9   :  { %v1498_v51 = vadd.f32 %v1497_v49, %v1496_v47  ;;  %v2249_v52 = vadd.f32 %v1521_v50, %v1520_v48  ;;  %v1499_v53 = vpop.f32.mrb[2].mxu0  ;;  %v1523_v54 = vpop.f32.mrb[2].mxu1 }
  0xfa   :  { %v1500_v55 = vpop.f32.mrb[3].mxu0  ;;  %v1524_v56 = vpop.f32.mrb[3].mxu1 }
  0xfb   :  { %v1501_v57 = vadd.f32 %v1500_v55, %v1499_v53  ;;  %v2251_v58 = vadd.f32 %v1524_v56, %v1523_v54  ;;  %v857_v36 = vadd.f32 %v1498_v51, %v2276_v31 }
  0xfd   :  { %v860_v43 = vadd.f32 %v1501_v57, %v2276_v31 }
  0xff   :  { %v1502_v59 = vpop.f32.mrb[4].mxu0  ;;  %v1526_v60 = vpop.f32.mrb[4].mxu1 }
 0x100   :  { %v1503_v61 = vpop.f32.mrb[5].mxu0  ;;  %v1527_v62 = vpop.f32.mrb[5].mxu1 }
 0x101   :  { %v1504_v63 = vadd.f32 %v1503_v61, %v1502_v59  ;;  %v2253_v0 = vadd.f32 %v1527_v62, %v1526_v60  ;;  %v1505_v1 = vpop.f32.mrb[6].mxu0  ;;  %v1529_v2 = vpop.f32.mrb[6].mxu1 }
 0x102   :  { %v1506_v3 = vpop.f32.mrb[7].mxu0  ;;  %v1530_v4 = vpop.f32.mrb[7].mxu1 }
 0x103   :  { %v1507_v5 = vadd.f32 %v1506_v3, %v1505_v1  ;;  %v2255_v6 = vadd.f32 %v1530_v4, %v1529_v2  ;;  %v865_v56 = vadd.f32 %v1504_v63, %v2276_v31 }
 0x105   :  { %v868_v57 = vadd.f32 %v1507_v5, %v2276_v31 }
 0x107   :  { %v1508_v7 = vpop.f32.mrb[8].mxu0  ;;  %v1532_v8 = vpop.f32.mrb[8].mxu1 }
 0x108   :  { %v1509_v9 = vpop.f32.mrb[9].mxu0  ;;  %v1533_v10 = vpop.f32.mrb[9].mxu1 }
 0x109   :  { %v2257_v11 = vadd.f32 %v1509_v9, %v1508_v7  ;;  %v2259_v12 = vadd.f32 %v1533_v10, %v1532_v8  ;;  %v1511_v13 = vpop.f32.mrb[10].mxu0  ;;  %v1535_v14 = vpop.f32.mrb[10].mxu1 }
 0x10a   :  { %v1512_v15 = vpop.f32.mrb[11].mxu0  ;;  %v1536_v16 = vpop.f32.mrb[11].mxu1 }
 0x10b   :  { %v2261_v17 = vadd.f32 %v1512_v15, %v1511_v13  ;;  %v2263_v18 = vadd.f32 %v1536_v16, %v1535_v14 }
 0x10f   :  { %v1514_v19 = vpop.f32.mrb[12].mxu0  ;;  %v1538_v20 = vpop.f32.mrb[12].mxu1 }
 0x110   :  { %v1515_v21 = vpop.f32.mrb[13].mxu0  ;;  %v1539_v22 = vpop.f32.mrb[13].mxu1 }
 0x111   :  { %v2265_v23 = vadd.f32 %v1515_v21, %v1514_v19  ;;  %v2267_v24 = vadd.f32 %v1539_v22, %v1538_v20  ;;  %v1517_v25 = vpop.f32.mrb[14].mxu0  ;;  %v1541_v26 = vpop.f32.mrb[14].mxu1  ;;  %v873_v21 = vadd.f32 %v2257_v11, %v2276_v31 }
 0x112   :  { %v1518_v27 = vpop.f32.mrb[15].mxu0  ;;  %v1542_v28 = vpop.f32.mrb[15].mxu1 }
 0x113   :  { %v2269_v29 = vadd.f32 %v1518_v27, %v1517_v25  ;;  %v2271_v30 = vadd.f32 %v1542_v28, %v1541_v26 }
 0x117   :  { %v1560_v32 = vpop.f32.mrb[16].mxu1  ;;  %v1624_v33 = vpop.f32.mrb[16].mxu0 }
 0x118   :  { %v1561_v34 = vpop.f32.mrb[17].mxu1  ;;  %v1625_v35 = vpop.f32.mrb[17].mxu0 }
 0x119   :  { %v1562_v37 = vadd.f32 %v1561_v34, %v1560_v32  ;;  %v1626_v38 = vadd.f32 %v1625_v35, %v1624_v33  ;;  %v1563_v39 = vpop.f32.mrb[18].mxu1  ;;  %v1627_v40 = vpop.f32.mrb[18].mxu0  ;;  %v876_v34 = vadd.f32 %v2261_v17, %v2276_v31 }
 0x11a   :  { %v1564_v41 = vpop.f32.mrb[19].mxu1  ;;  %v1628_v42 = vpop.f32.mrb[19].mxu0 }
 0x11b   :  { %v954_v44 = vadd.f32 %v1562_v37, %v857_v36  ;;  %v1565_v45 = vadd.f32 %v1564_v41, %v1563_v39  ;;  %v1629_v46 = vadd.f32 %v1628_v42, %v1627_v40 }
 0x11d   :  { %v1051_v47 = vadd.f32 %v1626_v38, %v954_v44  ;;  %v957_v48 = vadd.f32 %v1565_v45, %v860_v43 }
 0x11f   :  { %v1113_v49 = vmax.f32 %v1051_v47, 0.0  ;;  %v1054_v50 = vadd.f32 %v1629_v46, %v957_v48  ;;  %v1566_v53 = vpop.f32.mrb[20].mxu1  ;;  %v1630_v54 = vpop.f32.mrb[20].mxu0  ;;  %v881_v48 = vadd.f32 %v2265_v23, %v2276_v31 }
 0x120   :  { %v1567_v55 = vpop.f32.mrb[21].mxu1  ;;  %v1631_v51 = vpop.f32.mrb[21].mxu0 }
 0x121   :  { %v1114_v59 = vmax.f32 %v1054_v50, 0.0  ;;  %v1568_v60 = vadd.f32 %v1567_v55, %v1566_v53  ;;  %v1632_v61 = vadd.f32 %v1631_v51, %v1630_v54  ;;  %v1569_v62 = vpop.f32.mrb[22].mxu1  ;;  %v1633_v1 = vpop.f32.mrb[22].mxu0  ;;  %v1130_v2 = vsel %vm1129_vm1, %v1113_v49, 0.0 }
 0x122   :  { %v1570_v3 = vpop.f32.mrb[23].mxu1  ;;  %v1634_v4 = vpop.f32.mrb[23].mxu0 }
 0x123   :  { %v1131_v7 = vsel %vm1129_vm1, %v1114_v59, 0.0  ;;  %v962_v8 = vadd.f32 %v1568_v60, %v865_v56  ;;  %v1571_v9 = vadd.f32 %v1570_v3, %v1569_v62  ;;  %v1635_v10 = vadd.f32 %v1634_v4, %v1633_v1 }
 0x124   :  { %v1132_v13 = vadd.f32 %v1131_v7, %v1130_v2  ;;  %v884_v59 = vadd.f32 %v2269_v29, %v2276_v31 }
 0x125   :  { %v1059_v14 = vadd.f32 %v1632_v61, %v962_v8  ;;  %v965_v15 = vadd.f32 %v1571_v9, %v868_v57 }
 0x127   :  { %v1115_v63 = vmax.f32 %v1059_v14, 0.0  ;;  %v1062_v16 = vadd.f32 %v1635_v10, %v965_v15  ;;  %v1572_v19 = vpop.f32.mrb[24].mxu1  ;;  %v1636_v20 = vpop.f32.mrb[24].mxu0  ;;  %v889_v14 = vadd.f32 %v2249_v52, %v2276_v31 }
 0x128   :  { %v1573_v5 = vpop.f32.mrb[25].mxu1  ;;  %v1637_v22 = vpop.f32.mrb[25].mxu0 }
 0x129   :  { %v1133_v25 = vsel %vm1129_vm1, %v1115_v63, 0.0  ;;  %v1116_v26 = vmax.f32 %v1062_v16, 0.0  ;;  %v1574_v27 = vadd.f32 %v1573_v5, %v1572_v19  ;;  %v1638_v28 = vadd.f32 %v1637_v22, %v1636_v20  ;;  %v1575_v32 = vpop.f32.mrb[26].mxu1  ;;  %v1639_v33 = vpop.f32.mrb[26].mxu0 }
 0x12a   :  { %v1134_v35 = vadd.f32 %v1133_v25, %v1132_v13  ;;  %v1576_v36 = vpop.f32.mrb[27].mxu1  ;;  %v1640_v37 = vpop.f32.mrb[27].mxu0  ;;  %v892_v22 = vadd.f32 %v2251_v58, %v2276_v31  ;;  %v897_v58 = vadd.f32 %v2253_v0, %v2276_v31 }
 0x12b   :  { %v1135_v38 = vsel %vm1129_vm1, %v1116_v26, 0.0  ;;  %v970_v39 = vadd.f32 %v1574_v27, %v873_v21  ;;  %v1577_v40 = vadd.f32 %v1576_v36, %v1575_v32  ;;  %v1641_v11 = vadd.f32 %v1640_v37, %v1639_v33 }
 0x12c   :  { %v1136_v41 = vadd.f32 %v1135_v38, %v1134_v35 }
 0x12d   :  { %v1067_v42 = vadd.f32 %v1638_v28, %v970_v39  ;;  %v973_v43 = vadd.f32 %v1577_v40, %v876_v34 }
 0x12f   :  { %v1117_v44 = vmax.f32 %v1067_v42, 0.0  ;;  %v1070_v45 = vadd.f32 %v1641_v11, %v973_v43  ;;  %v1578_v46 = vpop.f32.mrb[28].mxu1  ;;  %v1642_v47 = vpop.f32.mrb[28].mxu0 }
 0x130   :  { %v1579_v49 = vpop.f32.mrb[29].mxu1  ;;  %v1643_v17 = vpop.f32.mrb[29].mxu0 }
 0x131   :  { %v1137_v50 = vsel %vm1129_vm1, %v1117_v44, 0.0  ;;  %v1118_v53 = vmax.f32 %v1070_v45, 0.0  ;;  %v1580_v54 = vadd.f32 %v1579_v49, %v1578_v46  ;;  %v1644_v55 = vadd.f32 %v1643_v17, %v1642_v47  ;;  %v1581_v51 = vpop.f32.mrb[30].mxu1  ;;  %v1645_v56 = vpop.f32.mrb[30].mxu0 }
 0x132   :  { %v1138_v60 = vadd.f32 %v1137_v50, %v1136_v41  ;;  %v1582_v61 = vpop.f32.mrb[31].mxu1  ;;  %v1646_v62 = vpop.f32.mrb[31].mxu0  ;;  %v900_v47 = vadd.f32 %v2255_v6, %v2276_v31 }
 0x133   :  { %v1139_v1 = vsel %vm1129_vm1, %v1118_v53, 0.0  ;;  %v978_v57 = vadd.f32 %v1580_v54, %v881_v48  ;;  %v1583_v2 = vadd.f32 %v1582_v61, %v1581_v51  ;;  %v1647_v23 = vadd.f32 %v1646_v62, %v1645_v56 }
 0x134   :  { %v1140_v3 = vadd.f32 %v1139_v1, %v1138_v60  ;;  %v905_v1 = vadd.f32 %v2259_v12, %v2276_v31 }
 0x135   :  { %v1075_v4 = vadd.f32 %v1644_v55, %v978_v57  ;;  %v981_v7 = vadd.f32 %v1583_v2, %v884_v59 }
 0x137   :  { %v1119_v8 = vmax.f32 %v1075_v4, 0.0  ;;  %v1078_v9 = vadd.f32 %v1647_v23, %v981_v7  ;;  %v1584_v10 = vpop.f32.mrb[32].mxu1  ;;  %v1648_v13 = vpop.f32.mrb[32].mxu0 }
 0x138   :  { %v1585_v15 = vpop.f32.mrb[33].mxu1  ;;  %v1649_v29 = vpop.f32.mrb[33].mxu0 }
 0x139   :  { %v1141_v63 = vsel %vm1129_vm1, %v1119_v8, 0.0  ;;  %v1120_v16 = vmax.f32 %v1078_v9, 0.0  ;;  %v1586_v19 = vadd.f32 %v1585_v15, %v1584_v10  ;;  %v1650_v20 = vadd.f32 %v1649_v29, %v1648_v13  ;;  %v1587_v21 = vpop.f32.mrb[34].mxu1  ;;  %v1651_v5 = vpop.f32.mrb[34].mxu0 }
 0x13a   :  { %v1142_v25 = vadd.f32 %v1141_v63, %v1140_v3  ;;  %v1588_v26 = vpop.f32.mrb[35].mxu1  ;;  %v1652_v27 = vpop.f32.mrb[35].mxu0  ;;  %v908_v9 = vadd.f32 %v2263_v18, %v2276_v31 }
 0x13b   :  { %v1143_v28 = vsel %vm1129_vm1, %v1120_v16, 0.0  ;;  %v986_v32 = vadd.f32 %v1586_v19, %v889_v14  ;;  %v1589_v33 = vadd.f32 %v1588_v26, %v1587_v21  ;;  %v1653_v52 = vadd.f32 %v1652_v27, %v1651_v5 }
 0x13c   :  { %v2302_v34 = vadd.f32 %v1143_v28, %v1142_v25  ;;  %v913_v26 = vadd.f32 %v2267_v24, %v2276_v31 }
 0x13d   :  { %v1083_v35 = vadd.f32 %v1650_v20, %v986_v32  ;;  %v989_v36 = vadd.f32 %v1589_v33, %v892_v22 }
 0x13f   :  { %v1121_v37 = vmax.f32 %v1083_v35, 0.0  ;;  %v1086_v38 = vadd.f32 %v1653_v52, %v989_v36  ;;  %v1590_v39 = vpop.f32.mrb[36].mxu1  ;;  %v1654_v40 = vpop.f32.mrb[36].mxu0 }
 0x140   :  { %v1591_v11 = vpop.f32.mrb[37].mxu1  ;;  %v1655_v41 = vpop.f32.mrb[37].mxu0 }
 0x141   :  { %v1122_v42 = vmax.f32 %v1086_v38, 0.0  ;;  %v1592_v43 = vadd.f32 %v1591_v11, %v1590_v39  ;;  %v1656_v44 = vadd.f32 %v1655_v41, %v1654_v40  ;;  %v1593_v45 = vpop.f32.mrb[38].mxu1  ;;  %v1657_v46 = vpop.f32.mrb[38].mxu0  ;;  %v1151_v48 = vsel %vm1129_vm1, %v1121_v37, 0.0 }
 0x142   :  { %v1594_v49 = vpop.f32.mrb[39].mxu1  ;;  %v1658_v17 = vpop.f32.mrb[39].mxu0  ;;  %v916_v37 = vadd.f32 %v2271_v30, %v2276_v31 }
 0x143   :  { %v1152_v50 = vsel %vm1129_vm1, %v1122_v42, 0.0  ;;  %v994_v53 = vadd.f32 %v1592_v43, %v897_v58  ;;  %v1595_v54 = vadd.f32 %v1594_v49, %v1593_v45  ;;  %v1659_v55 = vadd.f32 %v1658_v17, %v1657_v46 }
 0x144   :  { %v1153_v51 = vadd.f32 %v1152_v50, %v1151_v48  ;;  %v1145_v42 = vrot.slane %v2302_v34, 4 }
 0x145   :  { %v1091_v56 = vadd.f32 %v1656_v44, %v994_v53  ;;  %v997_v0 = vadd.f32 %v1595_v54, %v900_v47 }
 0x146   :  { %v1146_v48 = vadd.f32 %v1145_v42, %v2302_v34  ;;  %v1265_v34 = vld [vmem:[#allocation2] sm:$0x1] }
 0x147   :  { %v1123_v59 = vmax.f32 %v1091_v56, 0.0  ;;  %v1094_v60 = vadd.f32 %v1659_v55, %v997_v0  ;;  %v1596_v61 = vpop.f32.mrb[40].mxu1  ;;  %v1660_v62 = vpop.f32.mrb[40].mxu0 }
 0x148   :  { %v1597_v6 = vpop.f32.mrb[41].mxu1  ;;  %v1661_v57 = vpop.f32.mrb[41].mxu0  ;;  %v1147_v50 = vrot.slane %v1146_v48, 2 }
 0x149   :  { %v1154_v2 = vsel %vm1129_vm1, %v1123_v59, 0.0  ;;  %v1124_v23 = vmax.f32 %v1094_v60, 0.0  ;;  %v1598_v3 = vadd.f32 %v1597_v6, %v1596_v61  ;;  %v1662_v4 = vadd.f32 %v1661_v57, %v1660_v62  ;;  %v1599_v7 = vpop.f32.mrb[42].mxu1  ;;  %v1663_v8 = vpop.f32.mrb[42].mxu0  ;;  %v1475_v57 = vld [vmem:[%s2349_s4] ss:$0 sm:$0xff] }
 0x14a   :  { %v1155_v10 = vadd.f32 %v1154_v2, %v1153_v51  ;;  %v1600_v13 = vpop.f32.mrb[43].mxu1  ;;  %v1664_v14 = vpop.f32.mrb[43].mxu0  ;;  %v1148_v55 = vadd.f32 %v1147_v50, %v1146_v48  ;;  %v1892_v6 = vmov 0   ;;  %s1893_s4 = smov [#allocation4]  }
 0x14b   :  { %v1156_v15 = vsel %vm1129_vm1, %v1124_v23, 0.0  ;;  %v1002_v29 = vadd.f32 %v1598_v3, %v905_v1  ;;  %v1601_v63 = vadd.f32 %v1600_v13, %v1599_v7  ;;  %v1665_v12 = vadd.f32 %v1664_v14, %v1663_v8  ;;  %1740 = vset.pattern.permute.xlu0 %v1892_v6  ;;  %v1264_v7 = vld [vmem:[%s2350_s5] sm:$0x1]  ;;  %s1366_s1 = sshll.u32 %s1893_s4, 4  ;;  %s1367_s1 = int_to_ptr.vmem [resolvable:$true] %s1366_s1 }
 0x14c   :  { %v1157_v16 = vadd.f32 %v1156_v15, %v1155_v10  ;;  %v1149_v0 = vrot.slane %v1148_v55, 1  ;;  %1268 = vperm.xlu0 %1740, %v1265_v34   ;;  %v1271_v8 = vlaneseq  ;;  %s1865_s5 = scalar_lea.vmem %s1367_s1, 16  ;;  %s1869_s18 = scalar_lea.vmem %s1367_s1, 32 }
 0x14d   :  { %v1099_v19 = vadd.f32 %v1662_v4, %v1002_v29  ;;  %v1005_v20 = vadd.f32 %v1601_v63, %v908_v9  ;;  %p1866_p0 = scmp.ne.s32.totalorder %s1367_s1, %s1865_s5  ;;  %p1870_p1 = scmp.lt.s32.totalorder %s1367_s1, %s1367_s1 }
 0x14e   :  { %v1150_v61 = vadd.f32 %v1149_v0, %v1148_v55  ;;  %v1272_v9 = vshrl.u32 %v1271_v8, 7  ;;  %p1871_p2 = scmp.lt.s32.totalorder %s1869_s18, %s1865_s5 }
 0x14f   :  { %v1125_v21 = vmax.f32 %v1099_v19, 0.0  ;;  %v1102_v5 = vadd.f32 %v1665_v12, %v1005_v20  ;;  %v1602_v22 = vpop.f32.mrb[44].mxu1  ;;  %v1666_v25 = vpop.f32.mrb[44].mxu0 }
 0x150   :  { %v1603_v27 = vpop.f32.mrb[45].mxu1  ;;  %v1667_v18 = vpop.f32.mrb[45].mxu0  ;;  %v1273_v10 = vsub.s32 0, %v1272_v9  ;;  %p1872_p3 = por %p1871_p2, %p1870_p1 }
 0x151   :  { %v1158_v28 = vsel %vm1129_vm1, %v1125_v21, 0.0  ;;  %v1126_v32 = vmax.f32 %v1102_v5, 0.0  ;;  %v1604_v33 = vadd.f32 %v1603_v27, %v1602_v22  ;;  %v1668_v52 = vadd.f32 %v1667_v18, %v1666_v25  ;;  %v1605_v35 = vpop.f32.mrb[46].mxu1  ;;  %v1669_v36 = vpop.f32.mrb[46].mxu0 }
 0x152   :  { %v1159_v38 = vadd.f32 %v1158_v28, %v1157_v16  ;;  %v1606_v39 = vpop.f32.mrb[47].mxu1  ;;  %v1670_v40 = vpop.f32.mrb[47].mxu0  ;;  %p1873_p4 = pnand %p1872_p3, %p1866_p0 }
 0x153   :  { %v1160_v11 = vsel %vm1129_vm1, %v1126_v32, 0.0  ;;  %v1010_v41 = vadd.f32 %v1604_v33, %v913_v26  ;;  %v1607_v58 = vadd.f32 %v1606_v39, %v1605_v35  ;;  %v1671_v24 = vadd.f32 %v1670_v40, %v1669_v36 }
 0x154   :  { %v1161_v43 = vadd.f32 %v1160_v11, %v1159_v38 }
 0x155   :  { %v1107_v44 = vadd.f32 %v1668_v52, %v1010_v41  ;;  %v1013_v45 = vadd.f32 %v1607_v58, %v916_v37 }
 0x157   :  { %v1127_v46 = vmax.f32 %v1107_v44, 0.0  ;;  %v1110_v47 = vadd.f32 %v1671_v24, %v1013_v45 }
 0x159   :  { %v1162_v49 = vsel %vm1129_vm1, %v1127_v46, 0.0  ;;  %v1128_v30 = vmax.f32 %v1110_v47, 0.0 }
 0x15a   :  { %v1163_v31 = vadd.f32 %v1162_v49, %v1161_v43 }
 0x15b   :  { %v1164_v17 = vsel %vm1129_vm1, %v1128_v30, 0.0 }
 0x15c   :  { %v1165_v53 = vadd.f32 %v1164_v17, %v1163_v31 }
 0x15e   :  { %v1166_v54 = vrot.slane %v1165_v53, 4 }
 0x160   :  { %v1167_v51 = vadd.f32 %v1166_v54, %v1165_v53 }
 0x162   :  { %v1168_v56 = vrot.slane %v1167_v51, 2 }
 0x164   :  { %v1169_v59 = vadd.f32 %v1168_v56, %v1167_v51 }
 0x166   :  { %v1170_v60 = vrot.slane %v1169_v59, 1 }
 0x168   :  { %v1171_v62 = vadd.f32 %v1170_v60, %v1169_v59 }
 0x16a   :  { %v1190_v1 = vsel %vm1189_vm2, %v1171_v62, %v1150_v61 }
 0x16b   :  { %1700 = vmatmul.mubr.msk.f32.vlgmr.msra.gmra.mrb[48].mxu0 %vm1129_vm1, %v1190_v1 }
 0x1cb   :  { %v1269_v13 = vpop.permute.xlu0 %1268 }
 0x1cc   :  { %v1274_v14 = vrot.slane %v1269_v13, %v1273_v10 }
 0x23e   :  { %v1259_v2 = vpop.f32.mrb[48].mxu0 }
 0x23f   :  { %v1260_v23 = vadd.f32 %v1475_v57, %v1259_v2  ;;  %v1701_v3 = vpop.f32.mrb[49].mxu0 }
 0x241   :  { %v1263_v4 = vmax.f32 %v1260_v23, 0.0 }
 0x243   :  { %1703 = vmatpush3.xpose.msk.msra.mxu1 %vm1275_vm3, %v1263_v4 }
 0x246   :  { %1705 = vmatmul.mubr.msk.f32.vlgmr.msra.gmra.mrb[48].mxu1 %vm1275_vm3, %v1264_v7 }
 0x319   :  { %v1348_v15 = vpop.f32.mrb[48].mxu1 }
 0x31a   :  { %v1349_v29 = vadd.f32 %v1348_v15, %v1274_v14  ;;  %v1706_v63 = vpop.f32.mrb[49].mxu1 }
 0x31c   :  { %v1479_v12 = vmul.f32 -1.442695, %v1349_v29 }
 0x31e   :  { %1861 = vpow2.f32 %v1479_v12 }
 0x328   :  { %v1862_v16 = vpop.eup %1861 }
 0x329   :  { %v1355_v19 = vadd.f32 1.0, %v1862_v16 }
 0x32b   :  { %1863 = vrcp.f32 %v1355_v19 }
 0x335   :  { %v1864_v20 = vpop.eup %1863 }
 0x336   :  { %1359 = vst.msk [vmem:[#allocation4] sm:$0x1] %vm1358_vm4, %v1864_v20 }
 0x337   :  { %1876 = shalt.err (!%p1873_p4)
}
 0x338   :  { %s1877_s21 = scalar_lea.hbm %s2352_s7, 16 }
 0x339   :  { %p1878_p5 = scmp.ne.s32.totalorder %s2352_s7, %s1877_s21  ;;  %p1881_p6 = scmp.lt.u32.totalorder %s1877_s21, %s2352_s7 }
 0x33b   :  { %p1883_p7 = pnand %p1881_p6, %p1878_p5 }
 0x33d   :  { %1886 = shalt.err (!%p1883_p7)
}
 0x33e   :  { %1369 = dma.vmem_to_hbm [thread:$0]  %s1367_s1, 16, %s2352_s7, [#allocation5]  }
 0x33f   :  { %1887 = dma.done.wait [#allocation5], 16  }
 0x340   :  { %1888 = vsyncadd [#allocation5], 4294967280 }
 0x341   :  { %1373 = vsyncpa [#allocation5], 1 }

</bundles_post_ra>
